<compile_context>
chip_gen: v5e
topology: v5e:2x2
jax: 0.10.0
libtpu: 0.0.40
codegen_flags: <defaults>
</compile_context>

<pallas_src>
import functools

import jax
import jax.numpy as jnp
from jax import lax
from jax.experimental import pallas as pl
from jax.experimental.pallas import tpu as pltpu

_GOLDEN = 0x9E3779B9
_MIX = 0x85EBCA6B


def _hash_u32(x):
    """lowbias32 integer hash on uint32 values (wrapping arithmetic)."""
    x = x ^ (x >> 16)
    x = x * jnp.uint32(0x7FEB352D)
    x = x ^ (x >> 15)
    x = x * jnp.uint32(0x846CA68B)
    x = x ^ (x >> 16)
    return x


def _ffn_kernel(seed_ref, x_ref, w1t_ref, b1_ref, w2_ref, b2_ref, o_ref, acc_ref,
                *, dropout_p, training, tile_m, dim):
    # Grid: (m, k) with k the hidden-chunk reduction axis (innermost).
    k = pl.program_id(1)
    nk = pl.num_programs(1)

    use_dropout = bool(training) and float(dropout_p) > 0.0
    if use_dropout:
        # program_id / SMEM reads at kernel TOP LEVEL, not inside pl.when
        # (interpret-mode lowering rejects program_id inside the cond body).
        m0_u = lax.bitcast_convert_type(pl.program_id(0), jnp.uint32)
        seed_u = lax.bitcast_convert_type(seed_ref[0], jnp.uint32)
        tile_seed = _hash_u32(seed_u * jnp.uint32(_GOLDEN) + m0_u * jnp.uint32(_MIX))

    @pl.when(k == 0)
    def _init():
        acc_ref[...] = jnp.zeros_like(acc_ref)

    # GEMM 1 (bf16 MXU operands, f32 accumulate): x [tm, D] . w1t [tk, D]^T
    h = lax.dot_general(x_ref[...], w1t_ref[...],
                        dimension_numbers=(((1,), (1,)), ((), ())),
                        preferred_element_type=jnp.float32)
    h = jnp.maximum(h + b1_ref[...], 0.0)

    # GEMM 2: accumulate this hidden chunk's contribution to the output tile.
    acc_ref[...] += jnp.dot(h.astype(jnp.bfloat16), w2_ref[...],
                            preferred_element_type=jnp.float32)

    @pl.when(k == nk - 1)
    def _epilogue():
        y = acc_ref[...] + b2_ref[...]

        if use_dropout:
            keep_prob = 1.0 - float(dropout_p)
            rows = lax.broadcasted_iota(jnp.int32, (tile_m, dim), 0)
            cols = lax.broadcasted_iota(jnp.int32, (tile_m, dim), 1)
            lid = rows * dim + cols                      # tile-local, never overflows
            h32 = _hash_u32(lax.bitcast_convert_type(lid, jnp.uint32) ^ tile_seed)
            threshold = jnp.uint32(int(round(keep_prob * (1 << 24))))
            keep = (h32 >> 8) < threshold
            y = jnp.where(keep, y * jnp.float32(1.0 / keep_prob), jnp.float32(0.0))

        o_ref[...] = y.astype(o_ref.dtype)


def _vmem_bytes(tile_m, tile_k, D):
    """VMEM estimate assuming default double-buffering on every BlockSpec."""
    buf = 2
    return (buf * tile_m * D * 2        # x tile (bf16)
            + buf * tile_k * D * 2      # w1^T chunk (bf16)
            + buf * tile_k * 4          # b1 chunk (f32)
            + buf * tile_k * D * 2      # w2 chunk (bf16)
            + buf * D * 4               # b2 (f32)
            + buf * tile_m * D * 4      # out tile (f32)
            + tile_m * D * 4)           # f32 accumulator scratch


def _choose_tiles(M, D, H, budget_bytes):
    m_cands = [c for c in (1024, 512, 256, 128, 64, 32, 16, 8) if M % c == 0] or [M]
    # Keep >= 2 m-tiles when possible so the "parallel" axis can shard across
    # TensorCores (v7x has 2 TCs per chip).
    m_pref = [c for c in m_cands if M // c >= 2] or m_cands
    # Prefer tile_k == H (weights VMEM-resident, DMA'd once); never drop below
    # 256 unless the budget forces it (v6e/v7x MXU is 256-wide).
    k_cands = [H] + [c for c in (2048, 1024, 512, 256, 128) if c < H and H % c == 0]
    for tm in m_pref:                       # largest tile_m first (intensity)
        for tk in k_cands:                  # largest tile_k first (residency)
            if _vmem_bytes(tm, tk, D) <= budget_bytes:
                return tm, tk
    return m_pref[-1], k_cands[-1]


def feed_forward(x, w1, b1, w2, b2, *, dropout_p=0.2, training=True, seed=0,
                 tile_m=None, tile_k=None, vmem_limit_bytes=None):
    """x: [B, S, dim] f32; w1: [dim, 4*dim]; w2: [4*dim, dim] (PyTorch [in,out] layout)."""
    B, S, D = x.shape
    M = B * S
    H = w1.shape[1]
    assert w1.shape == (D, H) and w2.shape == (H, D)
    assert b1.shape == (H,) and b2.shape == (D,)

    # bf16 MXU operands prepared host-side: halves x/weight HBM traffic and the
    # corresponding VMEM blocks; removes per-step in-kernel casts.
    x2 = x.reshape(M, D).astype(jnp.bfloat16)
    w1t = jnp.asarray(w1, jnp.bfloat16).T          # [H, D]: contiguous (tile_k, D) row slabs
    w2_bf = jnp.asarray(w2, jnp.bfloat16)
    b1_2d = b1.reshape(1, H).astype(jnp.float32)
    b2_2d = b2.reshape(1, D).astype(jnp.float32)
    seed_arr = jnp.asarray([seed], dtype=jnp.int32)

    # Per-generation VMEM budget (128 MiB v5e/v6e, 64 MiB/TC v7x).
    if vmem_limit_bytes is None:
        try:
            cap = int(pltpu.get_tpu_info().vmem_capacity_bytes)
        except Exception:
            cap = 64 * 1024 * 1024
        vmem_limit_bytes = min(max(cap - 16 * 1024 * 1024, 32 * 1024 * 1024),
                               112 * 1024 * 1024)
    budget = int(vmem_limit_bytes * 0.85)

    auto_m, auto_k = _choose_tiles(M, D, H, budget)
    tile_m = auto_m if tile_m is None else tile_m
    tile_k = auto_k if tile_k is None else tile_k
    assert M % tile_m == 0 and H % tile_k == 0

    grid = (M // tile_m, H // tile_k)

    kernel = functools.partial(_ffn_kernel, dropout_p=float(dropout_p),
                               training=bool(training), tile_m=tile_m, dim=D)

    # Honest cost estimate: weights are re-streamed once per m tile unless the
    # whole hidden dim is resident (tile_k == H => constant block index).
    weight_passes = 1 if tile_k == H else grid[0]
    flops = 4 * M * D * H                                  # two GEMMs
    bytes_accessed = (M * D * 2                            # x (bf16)
                      + M * D * 4                          # out (f32)
                      + weight_passes * (2 * D * H * 2)    # w1 + w2 (bf16)
                      + H * 4 + D * 4 + 4)                 # biases + seed

    out = pl.pallas_call(
        kernel,
        out_shape=jax.ShapeDtypeStruct((M, D), x.dtype),
        grid_spec=pltpu.PrefetchScalarGridSpec(
            num_scalar_prefetch=0,
            grid=grid,
            in_specs=[
                pl.BlockSpec(memory_space=pltpu.MemorySpace.SMEM),   # seed
                pl.BlockSpec((tile_m, D), lambda m, k: (m, 0)),       # x tile (bf16)
                pl.BlockSpec((tile_k, D), lambda m, k: (k, 0)),       # w1^T row slab
                pl.BlockSpec((1, tile_k), lambda m, k: (0, k)),       # b1 chunk
                pl.BlockSpec((tile_k, D), lambda m, k: (k, 0)),       # w2 row slab
                pl.BlockSpec((1, D), lambda m, k: (0, 0)),            # b2
            ],
            out_specs=pl.BlockSpec((tile_m, D), lambda m, k: (m, 0)),
            scratch_shapes=[pltpu.VMEM((tile_m, D), jnp.float32)],    # f32 acc
        ),
        compiler_params=pltpu.CompilerParams(
            dimension_semantics=("parallel", "arbitrary"),
            vmem_limit_bytes=int(vmem_limit_bytes),
        ),
        cost_estimate=pl.CostEstimate(
            flops=flops, transcendentals=0, bytes_accessed=int(bytes_accessed)),
    )(seed_arr, x2, w1t, b1_2d, w2_bf, b2_2d)

    return out.reshape(B, S, D)


def init_params(key, dim):
    """Mirror nn.Linear init: U(-1/sqrt(fan_in), 1/sqrt(fan_in)); weights stored [in, out]."""
    k1, k2, k3, k4 = jax.random.split(key, 4)
    hidden = 4 * dim
    bound1 = 1.0 / (dim ** 0.5)
    bound2 = 1.0 / (hidden ** 0.5)
    w1 = jax.random.uniform(k1, (dim, hidden), jnp.float32, -bound1, bound1)
    b1 = jax.random.uniform(k2, (hidden,), jnp.float32, -bound1, bound1)
    w2 = jax.random.uniform(k3, (hidden, dim), jnp.float32, -bound2, bound2)
    b2 = jax.random.uniform(k4, (dim,), jnp.float32, -bound2, bound2)
    return w1, b1, w2, b2


if __name__ == "__main__":
    key = jax.random.PRNGKey(0)
    kx, kp = jax.random.split(key)

    # Small but lane-dense demo shape: dim=128, hidden=512, M = B*S = 16.
    B, S, dim = 2, 8, 128
    x = jax.random.normal(kx, (B, S, dim), dtype=jnp.float32)
    w1, b1, w2, b2 = init_params(kp, dim)

    # Forced small tiles exercise the (m=2, k=2) grid: parallel m axis plus a
    # 2-step hidden reduction through the f32 VMEM accumulator.
    tiles = dict(tile_m=8, tile_k=256)

    # Eval mode (dropout off): compare against a bf16-operand reference.
    y_eval = feed_forward(x, w1, b1, w2, b2, dropout_p=0.2, training=False, **tiles)
    y_eval = jax.block_until_ready(y_eval)
    assert y_eval.shape == (B, S, dim) and y_eval.dtype == jnp.float32

    x2_bf = x.reshape(-1, dim).astype(jnp.bfloat16)
    h_ref = jnp.maximum(
        jnp.dot(x2_bf, w1.astype(jnp.bfloat16),
                preferred_element_type=jnp.float32) + b1, 0.0)
    ref = jnp.dot(h_ref.astype(jnp.bfloat16), w2.astype(jnp.bfloat16),
                  preferred_element_type=jnp.float32) + b2
    assert jnp.allclose(y_eval.reshape(-1, dim), ref, atol=5e-2, rtol=5e-2)

    # Auto-tiled path (picks tile_k == H => VMEM-resident weights, fetched once).
    y_auto = jax.block_until_ready(
        feed_forward(x, w1, b1, w2, b2, dropout_p=0.2, training=False))
    assert jnp.allclose(y_auto, y_eval, atol=5e-2, rtol=5e-2)

    # Training mode: inverted dropout (p=0.2), deterministic seed.
    y_train = feed_forward(x, w1, b1, w2, b2, dropout_p=0.2, training=True,
                           seed=0, **tiles)
    y_train = jax.block_until_ready(y_train)
    keep_prob = 0.8
    dropped_frac = float(jnp.mean((y_train == 0.0).astype(jnp.float32)))
    assert 0.05 < dropped_frac < 0.5, dropped_frac
    scale = jnp.float32(1.0 / keep_prob)
    diff = jnp.where(y_train != 0.0, y_train - y_eval * scale, 0.0)
    assert float(jnp.max(jnp.abs(diff))) < 1e-3

    print("KERNEL_OK")
</pallas_src>

<mosaic_0001>
module attributes {stable_mosaic.version = 11 : i64} {
  func.func @_ffn_kernel(%arg0: i32, %arg1: i32, %arg2: memref<1xi32, #tpu.memory_space<smem>>, %arg3: memref<8x128xbf16, #tpu.memory_space<vmem>>, %arg4: memref<256x128xbf16, #tpu.memory_space<vmem>>, %arg5: memref<1x256xf32, #tpu.memory_space<vmem>>, %arg6: memref<256x128xbf16, #tpu.memory_space<vmem>>, %arg7: memref<1x128xf32, #tpu.memory_space<vmem>>, %arg8: memref<8x128xf32, #tpu.memory_space<vmem>>, %arg9: memref<8x128xf32, #tpu.memory_space<vmem>>) attributes {dimension_semantics = [#tpu.dimension_semantics<parallel>, #tpu.dimension_semantics<arbitrary>], iteration_bounds = array<i64: 2, 2>, scalar_prefetch = 0 : i64, scratch_operands = 1 : i64, tpu.core_type = #tpu.core_type<tc>, window_params = [{transform_indices = @transform_0, window_bounds = array<i64: 1>}, {transform_indices = @transform_1, window_bounds = array<i64: 8, 128>}, {transform_indices = @transform_2, window_bounds = array<i64: 256, 128>}, {transform_indices = @transform_3, window_bounds = array<i64: 1, 256>}, {transform_indices = @transform_4, window_bounds = array<i64: 256, 128>}, {pipeline_mode = #tpu.pipeline_mode<synchronous>, transform_indices = @transform_5, window_bounds = array<i64: 1, 128>}, {transform_indices = @transform_6, window_bounds = array<i64: 8, 128>}]} {
    %c0_i32 = arith.constant 0 : i32
    %0 = arith.cmpi eq, %arg1, %c0_i32 : i32
    %1 = arith.extui %0 : i1 to i32
    %c0_i32_0 = arith.constant 0 : i32
    %2 = arith.cmpi ne, %1, %c0_i32_0 : i32
    scf.if %2 {
      %cst_15 = arith.constant 0.000000e+00 : f32
      %20 = vector.broadcast %cst_15 : f32 to vector<8x128xf32>
      %c0_16 = arith.constant 0 : index
      %c0_17 = arith.constant 0 : index
      %21 = vector.load %arg9[%c0_16, %c0_17] : memref<8x128xf32, #tpu.memory_space<vmem>>, vector<8x128xf32>
      tpu.vector_store %arg9[%c0_16, %c0_17], %20 {strides = array<i32>} : memref<8x128xf32, #tpu.memory_space<vmem>>, vector<8x128xf32>,
    } else {
    }
    %c0 = arith.constant 0 : index
    %c0_1 = arith.constant 0 : index
    %3 = vector.load %arg3[%c0, %c0_1] : memref<8x128xbf16, #tpu.memory_space<vmem>>, vector<8x128xbf16>
    %c0_2 = arith.constant 0 : index
    %c0_3 = arith.constant 0 : index
    %4 = vector.load %arg4[%c0_2, %c0_3] : memref<256x128xbf16, #tpu.memory_space<vmem>>, vector<256x128xbf16>
    %cst = arith.constant dense<0.000000e+00> : vector<8x256xf32>
    %5 = tpu.matmul %3, %4, %cst {dimension_numbers = #tpu.dot_dimension_numbers<[1], [1], [0], [0], [0, 0, 1, 0], [], []>} : vector<8x128xbf16>, vector<256x128xbf16>, vector<8x256xf32> -> vector<8x256xf32>
    %c0_4 = arith.constant 0 : index
    %c0_5 = arith.constant 0 : index
    %6 = vector.load %arg5[%c0_4, %c0_5] : memref<1x256xf32, #tpu.memory_space<vmem>>, vector<1x256xf32>
    %7 = vector.broadcast %6 : vector<1x256xf32> to vector<8x256xf32>
    %8 = arith.addf %5, %7 : vector<8x256xf32>
    %cst_6 = arith.constant 0.000000e+00 : f32
    %9 = vector.broadcast %cst_6 : f32 to vector<8x256xf32>
    %10 = arith.maximumf %8, %9 : vector<8x256xf32>
    %c0_7 = arith.constant 0 : index
    %c0_8 = arith.constant 0 : index
    %11 = vector.load %arg9[%c0_7, %c0_8] : memref<8x128xf32, #tpu.memory_space<vmem>>, vector<8x128xf32>
    %12 = arith.truncf %10 : vector<8x256xf32> to vector<8x256xbf16>
    %c0_9 = arith.constant 0 : index
    %c0_10 = arith.constant 0 : index
    %13 = vector.load %arg6[%c0_9, %c0_10] : memref<256x128xbf16, #tpu.memory_space<vmem>>, vector<256x128xbf16>
    %cst_11 = arith.constant dense<0.000000e+00> : vector<8x128xf32>
    %14 = tpu.matmul %12, %13, %cst_11 {dimension_numbers = #tpu.dot_dimension_numbers<[1], [0], [0], [1], [0, 0, 1, 1], [], []>} : vector<8x256xbf16>, vector<256x128xbf16>, vector<8x128xf32> -> vector<8x128xf32>
    %15 = arith.addf %11, %14 : vector<8x128xf32>
    %c0_12 = arith.constant 0 : index
    %c0_13 = arith.constant 0 : index
    %16 = vector.load %arg9[%c0_12, %c0_13] : memref<8x128xf32, #tpu.memory_space<vmem>>, vector<8x128xf32>
    tpu.vector_store %arg9[%c0_12, %c0_13], %15 {strides = array<i32>} : memref<8x128xf32, #tpu.memory_space<vmem>>, vector<8x128xf32>,
    %c1_i32 = arith.constant 1 : i32
    %17 = arith.cmpi eq, %arg1, %c1_i32 : i32
    %18 = arith.extui %17 : i1 to i32
    %c0_i32_14 = arith.constant 0 : i32
    %19 = arith.cmpi ne, %18, %c0_i32_14 : i32
    scf.if %19 {
      %c0_15 = arith.constant 0 : index
      %c0_16 = arith.constant 0 : index
      %20 = vector.load %arg9[%c0_15, %c0_16] : memref<8x128xf32, #tpu.memory_space<vmem>>, vector<8x128xf32>
      %c0_17 = arith.constant 0 : index
      %c0_18 = arith.constant 0 : index
      %21 = vector.load %arg7[%c0_17, %c0_18] : memref<1x128xf32, #tpu.memory_space<vmem>>, vector<1x128xf32>
      %22 = vector.broadcast %21 : vector<1x128xf32> to vector<8x128xf32>
      %23 = arith.addf %20, %22 : vector<8x128xf32>
      %c0_19 = arith.constant 0 : index
      %c0_20 = arith.constant 0 : index
      %24 = vector.load %arg8[%c0_19, %c0_20] : memref<8x128xf32, #tpu.memory_space<vmem>>, vector<8x128xf32>
      tpu.vector_store %arg8[%c0_19, %c0_20], %23 {strides = array<i32>} : memref<8x128xf32, #tpu.memory_space<vmem>>, vector<8x128xf32>,
    } else {
    }
    return
  }
  func.func @transform_0(%arg0: i32, %arg1: i32) -> i32 {
    %c0_i32 = arith.constant 0 : i32
    %c0_i32_0 = arith.constant 0 : i32
    return %c0_i32 : i32
  }
  func.func @transform_1(%arg0: i32, %arg1: i32) -> (i32, i32) {
    %c0_i32 = arith.constant 0 : i32
    %c0_i32_0 = arith.constant 0 : i32
    return %arg0, %c0_i32 : i32, i32
  }
  func.func @transform_2(%arg0: i32, %arg1: i32) -> (i32, i32) {
    %c0_i32 = arith.constant 0 : i32
    %c0_i32_0 = arith.constant 0 : i32
    return %arg1, %c0_i32 : i32, i32
  }
  func.func @transform_3(%arg0: i32, %arg1: i32) -> (i32, i32) {
    %c0_i32 = arith.constant 0 : i32
    %c0_i32_0 = arith.constant 0 : i32
    return %c0_i32, %arg1 : i32, i32
  }
  func.func @transform_4(%arg0: i32, %arg1: i32) -> (i32, i32) {
    %c0_i32 = arith.constant 0 : i32
    %c0_i32_0 = arith.constant 0 : i32
    return %arg1, %c0_i32 : i32, i32
  }
  func.func @transform_5(%arg0: i32, %arg1: i32) -> (i32, i32) {
    %c0_i32 = arith.constant 0 : i32
    %c0_i32_0 = arith.constant 0 : i32
    %c0_i32_1 = arith.constant 0 : i32
    return %c0_i32, %c0_i32_0 : i32, i32
  }
  func.func @transform_6(%arg0: i32, %arg1: i32) -> (i32, i32) {
    %c0_i32 = arith.constant 0 : i32
    %c0_i32_0 = arith.constant 0 : i32
    return %arg0, %c0_i32 : i32, i32
  }
}

</mosaic_0001>

<bundles_post_ra>
// kernel: tpu_custom_call.1
= control target key start
LH: loop header
LB: loop body
LE: loop exit
PB: predicated region body
PF: predicated region fallthrough
CT: control target
= control target key end

     0   :  { %s1821_s0 = inlined_call_operand.<no memory space> [shape: s32[1], index: 0, kind: input, shape index: {}]   ;;  %s1822_s1 = inlined_call_operand.hbm [shape: bf16[16,128], index: 1, kind: input, shape index: {}]   ;;  %s1823_s2 = inlined_call_operand.hbm [shape: bf16[512,128], index: 2, kind: input, shape index: {}]   ;;  %s1824_s3 = inlined_call_operand.hbm [shape: f32[1,512], index: 3, kind: input, shape index: {}]   ;;  %s1825_s4 = inlined_call_operand.hbm [shape: bf16[512,128], index: 4, kind: input, shape index: {}]   ;;  %s1826_s5 = inlined_call_operand.vmem [shape: f32[1,128], index: 5, kind: input, shape index: {}]   ;;  %s1827_s6 = inlined_call_operand.hbm [shape: f32[16,128], index: 6, kind: output, shape index: {}]  }
   0x1   :  { %1845 = sst [smem:[#allocation29_spill]] %s1822_s1 }
   0x2   :  { %1846 = sst [smem:[#allocation30_spill]] %s1823_s2 }
   0x3   :  { %1847 = sst [smem:[#allocation31_spill]] %s1826_s5 }
   0x4   :  { %1848 = sst [smem:[#allocation32_spill]] %s1827_s6 }
   0x5   :  { %12 = vsyncpa [#allocation5], 0 }
   0x6   :  { %14 = vsyncpa [#allocation5 + $0x1], 0 }
   0x7   :  { %15 = vsyncpa [#allocation8], 0 }
   0x8   :  { %17 = vsyncpa [#allocation8 + $0x1], 0 }
   0x9   :  { %18 = vsyncpa [#allocation11], 0 }
   0xa   :  { %20 = vsyncpa [#allocation11 + $0x1], 0 }
   0xb   :  { %21 = vsyncpa [#allocation6], 0 }
   0xc   :  { %23 = vsyncpa [#allocation6 + $0x1], 0  ;;  %s1505_s0 = smov 0   ;;  %s1507_s21 = smov 0  }
   0xd   :  { %s1509_s22 = smov 0   ;;  %s1511_s23 = smov 0  }
   0xe   :  { %s1513_s24 = smov 0   ;;  %s1515_s25 = smov 0  }
   0xf   :  { %s1517_s26 = smov 0   ;;  %s1519_s27 = smov 0  }
  0x10   :  { %s1521_s28 = smov 0   ;;  %s1523_s29 = smov 0  }
  0x11   :  { %s1525_s30 = smov 0  }
  0x12 LB: > { %1849 = sst [smem:[#allocation17_spill]] %s1433_s22  ;;  %p77_p0 = scmp.eq.s32.totalorder %s1465_s30, 0  ;;  %s1465_s30 = sphi %s1525_s30, %s29_s30   ;;  %s1461_s29 = sphi %s1523_s29, %s1888_s29   ;;  %s1457_s28 = sphi %s1521_s28, %s1894_s28   ;;  %s1453_s27 = sphi %s1519_s27, %s1886_s27   ;;  %s1449_s26 = sphi %s1517_s26, %s1893_s26   ;;  %s1445_s25 = sphi %s1515_s25, %s1885_s25   ;;  %s1441_s24 = sphi %s1513_s24, %s1892_s24   ;;  %s1437_s23 = sphi %s1511_s23, %s1891_s23   ;;  %s1433_s22 = sphi %s1509_s22, %s1883_s22   ;;  %s1429_s21 = sphi %s1507_s21, %s1890_s21   ;;  %s1425_s0 = sphi %s1505_s0, %s1889_s0  }
  0x13   : > { %1850 = sst [smem:[#allocation18_spill]] %s1437_s23  ;;  %s95_s7 = sadd.s32 1, %s1433_s22 }
  0x14   : > { %1851 = sst [smem:[#allocation19_spill]] %s1445_s25  ;;  %p102_p1 = scmp.ne.s32.totalorder %s1433_s22, %s1429_s21 }
  0x15   : > { %1852 = sst [smem:[#allocation20_spill]] %s1453_s27  ;;  %p1833_p2 = scmp.lt.s32.totalorder %s1465_s30, 4 }
  0x16   : > { %1853 = sst [smem:[#allocation21_spill]] %s1461_s29  ;;  %s256_s8 = sand.u32 1, %s1465_s30  }
  0x17   : > { %1854 = sst [smem:[#allocation22_spill]] %s1465_s30  ;;  %p104_p3 = por %p102_p1, %p77_p0 }
  0x18   : > { %s1569_s9 = sand.u32 1, %s1433_s22   ;;  %s1831_s10 = sshll.u32 %s1457_s28, 7 }
  0x19   : > { %s1828_s11 = sshll.u32 %s1569_s9, 7  ;;  %s1855_s2 = sld [smem:[#allocation30_spill]] }
  0x1a   : > { %s260_s16 = scalar_lea.vmem [#allocation7], %s1828_s11  ;;  %p1582_p4 = pnand %p1833_p2, %p104_p3 }
  0x1b   : > { %s268_s17 = sshll.u32 %s260_s16, 4  ;;  %p920_p5 = scmp.ge.s32.totalorder %s1465_s30, 1  ;;  %s269_s17 = int_to_ptr.vmem [resolvable:$true] %s268_s17 }
  0x1c   : > { %s1587_s19 = scalar_lea.sflag [#allocation8], %s256_s8  ;;  %s1829_s20 = smov 64  }
  0x1d   : > { %s1830_s12 = smov 4   ;;  %p317_p6 = scmp.lt.s32.totalorder %s1465_s30, 5 }
  0x1e   : > { %s1601_s8 = sadd.s32 4294967295, %s1465_s30   ;;  %s38_s16 = sadd.s32 1, %s1457_s28 }
  0x1f   : > { %s265_s14 = scalar_lea.hbm %s1855_s2, %s1831_s10  ;;  %p1596_p7 = pnand %p920_p5, %p317_p6 }
  0x20   : > { %s266_s15 = sshll.u32 %s265_s14, 4  ;;  %s907_s14 = sadd.s32 4294967294, %s1465_s30   ;;  %s267_s15 = int_to_ptr.hbm [resolvable:$true] %s266_s15 }
  0x21   : > { %1110 = dma.hbm_to_vmem [thread:$0]  (!%p1582_p4), %s267_s15, 2048, %s269_s17, %s1587_s19, %s1829_s20, %s1829_s20, %s1830_s12  }
  0x22   : > { %s41_s11 = sadd.s32 1, %s1461_s29  ;;  %p39_p8 = scmp.ge.s32.totalorder %s38_s16, 2 }
  0x23   : > { %s69_s15 = sadd.s32 1, %s1445_s25  ;;  %p76_p9 = scmp.ne.s32.totalorder %s1445_s25, %s1441_s24 }
  0x24   : > { %p82_p10 = scmp.ne.s32.totalorder %s1441_s24, %s1437_s23  ;;  %s1896_s16 = smov (%p39_p8, %s38_s16), 0 }
  0x25   : > { %1858 = sst [smem:[#allocation23_spill]] %s1896_s16  ;;  %s1898_s11 = smov (!%p39_p8, %s41_s11), %s1461_s29 }
  0x26   : > { %p1619_p11 = por %p77_p0, %p76_p9  ;;  %p83_p12 = scmp.eq.s32.totalorder %s1601_s8, 0 }
  0x27   : > { %p43_p13 = scmp.ge.s32.totalorder %s1898_s11, 2  ;;  %s92_s20 = ssub.s32 %s1457_s28, %s1896_s16 }
  0x28   : > { %p1629_p1 = por %p83_p12, %p82_p10  ;;  %p93_p3 = scmp.eq.s32.totalorder %s92_s20, 0 }
  0x29   : > { %s1900_s11 = smov (%p43_p13, %s1898_s11), 0  ;;  %p108_p0 = scmp.ne.s32.totalorder %s1429_s21, %s1425_s0 }
  0x2a   : > { %1861 = sst [smem:[#allocation24_spill]] %s1900_s11  ;;  %s66_s2 = ssub.s32 %s1461_s29, %s1900_s11 }
  0x2b   : > { %s1638_s10 = scalar_select %p93_p3, %s1433_s22, %s95_s7  }
  0x2c   : > { %p67_p5 = scmp.eq.s32.totalorder %s66_s2, 0  ;;  %p205_p6 = scmp.eq.s32.totalorder %s1601_s8, 3 }
  0x2d   : > { %1862 = sst [smem:[#allocation25_spill]] %s1638_s10  ;;  %p1645_p8 = por %p108_p0, %p83_p12 }
  0x2e   : > { %p211_p2 = scmp.eq.s32.totalorder %s907_s14, 3  ;;  %p1655_p13 = por %p205_p6, %p76_p9 }
  0x2f   : > { %s1650_s20 = scalar_select %p67_p5, %s1445_s25, %s69_s15  }
  0x30   : > { %s1865_s6 = scalar_select %p1655_p13, 1, 0 }
  0x31   : > { %1864 = sst [smem:[#allocation26_spill]] %s1650_s20  ;;  %p1662_p3 = por %p211_p2, %p82_p10 }
  0x32   : > { %1866 = sst [smem:[#allocation27_spill]] %s1865_s6  ;;  %s237_s0 = sand.u32 1, %s1445_s25  }
  0x33   : > { %s1867_s2 = scalar_select %p1662_p3, 1, 0 }
  0x34   : > { %s911_s7 = sshll.u32 %s1461_s29, 2  ;;  %s910_s11 = sshll.u32 %s237_s0, 2 }
  0x35   : > { %1868 = sst [smem:[#allocation28_spill]] %s1867_s2  ;;  %s241_s15 = scalar_lea.vmem [#allocation4], %s910_s11 }
  0x36   : > { %s1869_s1 = sld [smem:[#allocation29_spill]]  ;;  %s249_s20 = sshll.u32 %s241_s15, 4  ;;  %s250_s20 = int_to_ptr.vmem [resolvable:$true] %s249_s20 }
  0x37   : > { %p1870_p2 = scmp.lt.s32.totalorder %s1465_s30, 4  ;;  %s915_s2 = sshll.u32 %s1569_s9, 1 }
  0x38   : > { %s916_s25 = sshll.u32 %s1457_s28, 1  ;;  %s282_s11 = scalar_lea.vmem [#allocation9], %s915_s2 }
  0x39   : > { %p1105_p9 = pnand %p1870_p2, %p1619_p11  ;;  %s286_s22 = scalar_lea.hbm %s1824_s3, %s916_s25 }
  0x3a   : > { %s288_s10 = sshll.u32 %s286_s22, 4  ;;  %s1871_s17 = sshll.u32 %s1457_s28, 7  ;;  %s289_s10 = int_to_ptr.hbm [resolvable:$true] %s288_s10 }
  0x3b   : > { %s306_s30 = scalar_lea.hbm %s1825_s4, %s1871_s17  ;;  %s1872_s6 = sshll.u32 %s1569_s9, 7 }
  0x3c   : > { %s245_s27 = scalar_lea.hbm %s1869_s1, %s911_s7  ;;  %s290_s7 = sshll.u32 %s282_s11, 4  ;;  %s291_s7 = int_to_ptr.vmem [resolvable:$true] %s290_s7 }
  0x3d   : > { %s247_s14 = sshll.u32 %s245_s27, 4  ;;  %s238_s27 = scalar_lea.sflag [#allocation5], %s237_s0  ;;  %s248_s14 = int_to_ptr.hbm [resolvable:$true] %s247_s14 }
  0x3e   : > { %1107 = dma.hbm_to_vmem [thread:$0]  (!%p1105_p9), %s248_s14, 64, %s250_s20, %s238_s27  }
  0x3f   : > { %1113 = dma.hbm_to_vmem [thread:$0]  (!%p1582_p4), %s289_s10, 32, %s291_s7, %s1587_s19  }
  0x40   : > { %s301_s5 = scalar_lea.vmem [#allocation10], %s1872_s6  ;;  %s307_s29 = sshll.u32 %s306_s30, 4  ;;  %s308_s29 = int_to_ptr.hbm [resolvable:$true] %s307_s29 }
  0x41   : > { %s309_s23 = sshll.u32 %s301_s5, 4  ;;  %s298_s25 = scalar_lea.sflag [#allocation11], %s1569_s9  ;;  %s310_s23 = int_to_ptr.vmem [resolvable:$true] %s309_s23 }
  0x42   : > { %s1873_s20 = smov 4   ;;  %s1874_s2 = smov 64  }
  0x43   : > { %1116 = dma.hbm_to_vmem [thread:$0]  (!%p1582_p4), %s308_s29, 2048, %s310_s23, %s298_s25, %s1874_s2, %s1874_s2, %s1873_s20  }
  0x44   : > { %321 = sbr.rel (%p1596_p7) target bundleno = 455 (0x1c7), region = 44  ;;  %s1699_s19 = sand.u32 (!%p1596_p7), 1, %s1441_s24  }
  0x45   : > { %s921_s1 = sshll.u32 (!%p1596_p7), %s1699_s19, 2  ;;  %s324_s5 = scalar_lea.sflag (!%p1596_p7), [#allocation5], %s1699_s19 }
  0x46   : > { %s1703_s6 = scalar_lea.vmem (!%p1596_p7), [#allocation4], %s921_s1 }
  0x49   : > { %1408 = dma.done.wait (%p1629_p1), %s324_s5, 64  }
  0x4a   : > { %1410 = vsyncadd (%p1629_p1), %s324_s5, 4294967232  ;;  %s333_s30 = sand.u32 1, %s1601_s8   ;;  %s335_s9 = sand.u32 1, %s1429_s21  }
  0x4b   : > { %s922_s18 = sshll.u32 %s335_s9, 7  ;;  %s334_s13 = scalar_lea.sflag [#allocation8], %s333_s30 }
  0x4c   : > { %s1711_s0 = scalar_lea.vmem [#allocation7], %s922_s18 }
  0x4d   : > { %1412 = dma.done.wait (%p1645_p8), %s334_s13, 2080  }
  0x4e   : > { %1414 = vsyncadd (%p1645_p8), %s334_s13, 4294965216  ;;  %s923_s14 = sshll.u32 %s335_s9, 1  ;;  %s354_s12 = scalar_lea.sflag [#allocation11], %s335_s9 }
  0x4f   : > { %s1717_s22 = scalar_lea.vmem [#allocation9], %s923_s14  ;;  %s1719_s27 = scalar_lea.vmem [#allocation10], %s922_s18 }
  0x50   : > { %1416 = dma.done.wait (%p1645_p8), %s354_s12, 2048  }
  0x51   : > { %1418 = vsyncadd (%p1645_p8), %s354_s12, 4294965248  ;;  %s925_s8 = sshll.u32 %s1699_s19, 3  ;;  %p926_p4 = scmp.ne.s32.totalorder %s1449_s26, 0 }
  0x52   : > { %s1726_s10 = scalar_lea.vmem [#allocation12], %s925_s8 }
  0x53   : > { %408 = sbr.rel (%p926_p4) target bundleno = 90 (0x5a), region = 64 }
  0x58   : > { %v1469_v0 = vmov 0.0  }
  0x59   : > { %409 = vst [vmem:[#allocation2] sm:$0xff] %v1469_v0 }
  0x5a PF: > { %v1069_v1 = vld [vmem:[%s1711_s0 + $0x38] sm:$0xff]  ;;  %v1068_v3 = vld [vmem:[%s1711_s0 + $0x30] sm:$0xff]  ;;  %v1067_v5 = vld [vmem:[%s1711_s0 + $0x28] sm:$0xff]  ;;  %p1055_p7 = scmp.ne.s32.totalorder %s1449_s26, 1 }
  0x5b   : > { %v1077_v2 = vld [vmem:[%s1711_s0 + $0x78] sm:$0xff]  ;;  %545 = vmatpush.bf16.xpose.msra.mxu0 %v1069_v1  ;;  %v1076_v4 = vld [vmem:[%s1711_s0 + $0x70] sm:$0xff]  ;;  %v1075_v6 = vld [vmem:[%s1711_s0 + $0x68] sm:$0xff]  ;;  %s1875_s7 = sld [smem:[#allocation31_spill]] (!%p1055_p7) }
  0x5c   : > { %558 = vmatpush.bf16.xpose.msra.mxu1 %v1077_v2  ;;  %v1066_v7 = vld [vmem:[%s1711_s0 + $0x20] sm:$0xff]  ;;  %v1065_v9 = vld [vmem:[%s1711_s0 + $0x18] sm:$0xff]  ;;  %v1064_v15 = vld [vmem:[%s1711_s0 + $0x10] sm:$0xff] }
  0x5d   : > { %v1074_v8 = vld [vmem:[%s1711_s0 + $0x60] sm:$0xff]  ;;  %v1073_v10 = vld [vmem:[%s1711_s0 + $0x58] sm:$0xff]  ;;  %v1072_v16 = vld [vmem:[%s1711_s0 + $0x50] sm:$0xff] }
  0x5e   : > { %v1085_v11 = vld [vmem:[%s1719_s27 + $0x38] sm:$0xff]  ;;  %v1084_v13 = vld [vmem:[%s1719_s27 + $0x30] sm:$0xff]  ;;  %v1083_v17 = vld [vmem:[%s1719_s27 + $0x28] sm:$0xff] }
  0x5f   : > { %v1093_v12 = vld [vmem:[%s1719_s27 + $0x78] sm:$0xff]  ;;  %704 = vmatpush.bf16.msra.mxu2 %v1085_v11  ;;  %v1092_v14 = vld [vmem:[%s1719_s27 + $0x70] sm:$0xff]  ;;  %v1091_v18 = vld [vmem:[%s1719_s27 + $0x68] sm:$0xff] }
  0x60   : > { %717 = vmatpush.bf16.msra.mxu3 %v1093_v12  ;;  %v1082_v19 = vld [vmem:[%s1719_s27 + $0x20] sm:$0xff]  ;;  %v1081_v23 = vld [vmem:[%s1719_s27 + $0x18] sm:$0xff]  ;;  %v1080_v25 = vld [vmem:[%s1719_s27 + $0x10] sm:$0xff] }
  0x61   : > { %v1090_v20 = vld [vmem:[%s1719_s27 + $0x60] sm:$0xff]  ;;  %v1089_v24 = vld [vmem:[%s1719_s27 + $0x58] sm:$0xff]  ;;  %v1088_v26 = vld [vmem:[%s1719_s27 + $0x50] sm:$0xff] }
  0x62   : > { %v1063_v21 = vld [vmem:[%s1711_s0 + $0x8] sm:$0xff]  ;;  %v1062_v27 = vld [vmem:[%s1711_s0] sm:$0xff]  ;;  %v410_v29 = vld [vmem:[%s1703_s6] sm:$0xf] }
  0x63   : > { %546 = vmatpush.bf16.xpose.msra.mxu0 %v1068_v3  ;;  %705 = vmatpush.bf16.msra.mxu2 %v1084_v13  ;;  %v1071_v22 = vld [vmem:[%s1711_s0 + $0x48] sm:$0xff]  ;;  %v1070_v28 = vld [vmem:[%s1711_s0 + $0x40] sm:$0xff]  ;;  %v573_v48 = vld [vmem:[#allocation2] sm:$0xff] }
  0x64   : > { %559 = vmatpush.bf16.xpose.msra.mxu1 %v1076_v4  ;;  %718 = vmatpush.bf16.msra.mxu3 %v1092_v14  ;;  %v1079_v30 = vld [vmem:[%s1719_s27 + $0x8] sm:$0xff]  ;;  %v1078_v32 = vld [vmem:[%s1719_s27] sm:$0xff]  ;;  %v443_v34 = vld [vmem:[%s1717_s22] sm:$0x3] }
  0x65   : > { %v1087_v31 = vld [vmem:[%s1719_s27 + $0x48] sm:$0xff]  ;;  %v1086_v33 = vld [vmem:[%s1719_s27 + $0x40] sm:$0xff]  ;;  %v445_v35 = vperm.slane %v443_v34, 0  ;;  %v446_v36 = vperm.slane %v443_v34, 1 }
  0x67   : > { %706 = vmatpush.bf16.msra.mxu2 %v1083_v17 }
  0x68   : > { %719 = vmatpush.bf16.msra.mxu3 %v1091_v18 }
  0x6b   : > { %547 = vmatpush.bf16.xpose.msra.mxu0 %v1067_v5  ;;  %707 = vmatpush.bf16.msra.mxu2 %v1082_v19 }
  0x6c   : > { %560 = vmatpush.bf16.xpose.msra.mxu1 %v1075_v6  ;;  %720 = vmatpush.bf16.msra.mxu3 %v1090_v20 }
  0x6f   : > { %708 = vmatpush.bf16.msra.mxu2 %v1081_v23 }
  0x70   : > { %721 = vmatpush.bf16.msra.mxu3 %v1089_v24 }
  0x73   : > { %548 = vmatpush.bf16.xpose.msra.mxu0 %v1066_v7  ;;  %709 = vmatpush.bf16.msra.mxu2 %v1080_v25 }
  0x74   : > { %561 = vmatpush.bf16.xpose.msra.mxu1 %v1074_v8  ;;  %722 = vmatpush.bf16.msra.mxu3 %v1088_v26 }
  0x77   : > { %710 = vmatpush.bf16.msra.mxu2 %v1079_v30 }
  0x78   : > { %723 = vmatpush.bf16.msra.mxu3 %v1087_v31 }
  0x7b   : > { %549 = vmatpush.bf16.xpose.msra.mxu0 %v1065_v9  ;;  %711 = vmatpush.bf16.msra.mxu2 %v1078_v32 }
  0x7c   : > { %562 = vmatpush.bf16.xpose.msra.mxu1 %v1073_v10  ;;  %724 = vmatpush.bf16.msra.mxu3 %v1086_v33 }
  0x83   : > { %550 = vmatpush.bf16.xpose.msra.mxu0 %v1064_v15 }
  0x84   : > { %563 = vmatpush.bf16.xpose.msra.mxu1 %v1072_v16 }
  0x8b   : > { %551 = vmatpush.bf16.xpose.msra.mxu0 %v1063_v21 }
  0x8c   : > { %564 = vmatpush.bf16.xpose.msra.mxu1 %v1071_v22 }
  0x93   : > { %552 = vmatpush.bf16.xpose.msra.mxu0 %v1062_v27 }
  0x94   : > { %565 = vmatpush.bf16.xpose.msra.mxu1 %v1070_v28 }
  0x9a   : > { %553 = vmatmul.bf16.vlgmr.msra.gmra.mxu0 %v410_v29 }
  0x9b   : > { %566 = vmatmul.bf16.vlgmr.msra.gmra.mxu1 %v410_v29 }
 0x117   : > { %v554_v37 = vpop.f32.mrf.mxu0 }
 0x118   : > { %v567_v38 = vpop.f32.mrf.mxu1  ;;  %v555_v39 = vadd.f32 %v554_v37, %v445_v35 }
 0x119   : > { %v568_v40 = vadd.f32 %v567_v38, %v446_v36 }
 0x11a   : > { %v571_v41 = vmax.f32 %v555_v39, 0.0 }
 0x11b   : > { %v572_v42 = vmax.f32 %v568_v40, 0.0 }
 0x11c   : > { %v574_v43 = vpack.c.bf16 %v571_v41, %v571_v41 }
 0x11d   : > { %v575_v44 = vpack.c.bf16 %v572_v42, %v572_v42 }
 0x11e   : > { %712 = vmatmul.bf16.vlgmr.msra.gmra.mxu2 %v574_v43 }
 0x11f   : > { %725 = vmatmul.bf16.vlgmr.msra.gmra.mxu3 %v575_v44  ;;  %v556_v45 = vpop.f32.mrf.mxu0 }
 0x120   : > { %v569_v46 = vpop.f32.mrf.mxu1 }
 0x1a1   : > { %v713_v47 = vpop.f32.mrf.mxu2 }
 0x1a2   : > { %v726_v49 = vpop.f32.mrf.mxu3 }
 0x1a3   : > { %v727_v50 = vadd.f32 %v726_v49, %v713_v47 }
 0x1a5   : > { %v730_v51 = vadd.f32 %v727_v50, %v573_v48 }
 0x1a6   : > { %735 = sbr.rel (%p1055_p7) target bundleno = 434 (0x1b2), region = 68 }
 0x1a7   : > { %731 = vst [vmem:[#allocation2] sm:$0xff] %v730_v51 }
 0x1a9   : > { %v715_v52 = vpop.f32.mrf.mxu2 }
 0x1aa   : > { %v728_v53 = vpop.f32.mrf.mxu3 }
 0x1ab   : > { %v1214_v55 = vld [vmem:[%s1875_s7] ss:$0 sm:$0xff] }
 0x1ae   : > { %v736_v54 = vld [vmem:[#allocation2] sm:$0xff] }
 0x1af   : > { %v741_v56 = vadd.f32 %v1214_v55, %v736_v54 }
 0x1b1   : > { %742 = vst [vmem:[%s1726_s10] sm:$0xff] %v741_v56 }
 0x1b2 PF: > { %s1876_s17 = sld [smem:[#allocation20_spill]]  ;;  %s756_s26 = sshll.u32 %s1726_s10, 4  ;;  %s757_s26 = int_to_ptr.vmem [resolvable:$true] %s756_s26 }
 0x1b3   : > { %s1878_s20 = sld [smem:[#allocation32_spill]]  ;;  %s744_s5 = scalar_lea.sflag [#allocation6], %s1699_s19 }
 0x1b8   : > { %s1057_s23 = sshll.u32 %s1876_s17, 3 }
 0x1b9   : > { %s754_s2 = scalar_lea.hbm %s1878_s20, %s1057_s23  ;;  %s1355_s13 = scalar_lea.hbm %s1878_s20, 16 }
 0x1ba   : > { %s758_s1 = sshll.u32 %s754_s2, 4  ;;  %s759_s1 = int_to_ptr.hbm [resolvable:$true] %s758_s1 }
 0x1bb   : > { %s1349_s6 = sshra.s32 %s759_s1, 4  ;;  %s1350_s6 = int_to_ptr.hbm [resolvable:$true] %s1349_s6 }
 0x1bc   : > { %s1351_s30 = scalar_lea.hbm %s1350_s6, 8  ;;  %p1356_p1 = scmp.lt.s32.totalorder %s1350_s6, %s1878_s20 }
 0x1bd   : > { %p1352_p10 = scmp.ne.s32.totalorder %s1350_s6, %s1351_s30  ;;  %p1357_p0 = scmp.lt.s32.totalorder %s1355_s13, %s1351_s30 }
 0x1bf   : > { %p1353_p11 = pnand %p1352_p10, %p1655_p13  ;;  %p1358_p5 = por %p1357_p0, %p1356_p1 }
 0x1c1   : > { %p1354_p12 = pneg %p1353_p11 }
 0x1c3   : > { %p1359_p6 = pnand %p1358_p5, %p1354_p12 }
 0x1c5   : > { %1362 = shalt.err (!%p1359_p6)
}
 0x1c6   : > { %1102 = dma.vmem_to_hbm [thread:$0]  (%p1655_p13), %s757_s26, 128, %s759_s1, %s744_s5  }
 0x1c7 PF: > { %s1879_s19 = sld [smem:[#allocation22_spill]] }
 0x1c8   : > { %s1880_s22 = sld [smem:[#allocation18_spill]] }
 0x1cd   : > { %p1122_p8 = scmp.ge.s32.totalorder %s1879_s19, 2 }
 0x1ce   : > { %s770_s27 = sand.u32 1, %s1880_s22  }
 0x1cf   : > { %p1118_p2 = pnand %p1122_p8, %p1662_p3  ;;  %s771_s8 = scalar_lea.sflag [#allocation6], %s770_s27 }
 0x1d1   : > { %p1119_p9 = pneg %p1118_p2 }
 0x1d3   : > { %1420 = dma.done.wait (%p1119_p9), %s771_s8, 128  }
 0x1d4   : > { %1422 = vsyncadd (%p1119_p9), %s771_s8, 4294967168  ;;  %s29_s30 = sadd.s32 1, %s1879_s19   ;;  %s1882_s10 = sld [smem:[#allocation17_spill]] }
 0x1d5   : > { %p26_p4 = scmp.ge.s32.totalorder %s29_s30, 6   ;;  %s1883_s22 = sld [smem:[#allocation25_spill]] }
 0x1d6   : > { %s1884_s16 = sld [smem:[#allocation19_spill]]  ;;  %s1889_s0 = smov %s1429_s21 }
 0x1d7   : > { %s1885_s25 = sld [smem:[#allocation26_spill]]  ;;  %s1891_s23 = smov %s1441_s24 }
 0x1d8   : > { %s1886_s27 = sld [smem:[#allocation21_spill]]  ;;  %s1893_s26 = smov %s1457_s28 }
 0x1d9   : > { %s1887_s11 = sld [smem:[#allocation23_spill]] }
 0x1da   : > { %s1888_s29 = sld [smem:[#allocation24_spill]]  ;;  %s1890_s21 = smov %s1882_s10 }
 0x1db   :  { %28 = sbr.rel (!%p26_p4) target bundleno = 18 (0x12), region = 134 }
 0x1dc   : > { %s1892_s24 = smov %s1884_s16 }
 0x1df   : > { %s1894_s28 = smov %s1887_s11 }
 0x1e0   :  { %777 = vsyncpa [#allocation5], 1 }
 0x1e1   :  { %779 = vsyncpa [#allocation5 + $0x1], 1 }
 0x1e2   :  { %780 = vsyncpa [#allocation8], 1 }
 0x1e3   :  { %782 = vsyncpa [#allocation8 + $0x1], 1 }
 0x1e4   :  { %783 = vsyncpa [#allocation11], 1 }
 0x1e5   :  { %785 = vsyncpa [#allocation11 + $0x1], 1 }
 0x1e6   :  { %786 = vsyncpa [#allocation6], 1 }
 0x1e7   :  { %788 = vsyncpa [#allocation6 + $0x1], 1 }

</bundles_post_ra>
